<compile_context>
chip_gen: v7x
topology: tpu7x:2x2x1
jax: 0.10.0
libtpu: 0.0.40
codegen_flags: <defaults>
</compile_context>

<pallas_src>
import functools

import jax
import jax.numpy as jnp
from jax.experimental import pallas as pl
from jax.experimental.pallas import tpu as pltpu


def _round_up(x, m):
    return ((x + m - 1) // m) * m


def _cdiv(a, b):
    return (a + b - 1) // b


# ----------------------------- per-gen sizing --------------------------------


def _device_budgets():
    """(input-pipeline VMEM budget, vmem_limit cap, dual-TensorCore?) per gen."""
    try:
        kind = jax.devices()[0].device_kind.lower()
    except Exception:
        kind = ""
    if "v6" in kind:
        # v6e: 32 MiB scoped default / 128 MiB physical -> big tiles + explicit limit.
        return 44 << 20, 96 << 20, False
    if "v7" in kind or "7x" in kind:
        # v7x: 64 MiB physical per TensorCore, 2 TCs/chip.
        return 22 << 20, 44 << 20, True
    # v5e / v5p / v4 / unknown: stay near the 16 MiB scoped-default era.
    return 12 << 20, 28 << 20, False


def _choose_tiles(B, C, S, itemsize, b_tile, s_tile):
    input_budget, vmem_cap, dual_core = _device_budgets()
    per_block = max(1, input_budget // 6)          # 3 inputs x 2 pipeline buffers
    s_full = _round_up(S, 128)

    if b_tile is None:
        if B <= 8:
            b_tile = B                             # == full dim -> always legal block
        else:
            # Output block (b_tile, 3) needs b_tile % 8 == 0 (or == B).
            n_min = 2 if dual_core else 1          # v7x: >=2 parallel b-tiles -> 2 TCs
            b_tile = max(8, ((B // n_min) // 8) * 8)
            # Prefer lane-dense full-S blocks: shrink b_tile before shrinking s_tile.
            while b_tile > 8 and b_tile * C * s_full * itemsize > per_block:
                b_tile -= 8
    assert b_tile == B or (b_tile % 8 == 0 and b_tile <= B), (
        "b_tile must equal B or be a multiple of 8 (<= B)")

    if s_tile is None:
        max_lanes = per_block // max(1, b_tile * C * itemsize)
        s_tile = min(s_full, max(128, (max_lanes // 128) * 128))
    assert s_tile % 128 == 0 and s_tile >= 128

    return b_tile, s_tile, vmem_cap


# --------------------------------- kernel ------------------------------------


def _erf(x):
    # Abramowitz & Stegun 7.1.26 (|abs err| < 1.5e-7): reproduces torch's exact
    # erf-GELU to well within fp32 1e-4 tolerance.
    # TODO(synk): jax.lax.erf would give bit-closer parity if its Mosaic
    # lowering is available on the target jaxlib.
    a1, a2, a3 = 0.254829592, -0.284496736, 1.421413741
    a4, a5, p = -1.453152027, 1.061405429, 0.3275911
    z = jnp.abs(x)
    t = 1.0 / (1.0 + p * z)
    poly = ((((a5 * t + a4) * t + a3) * t + a2) * t + a1) * t
    y = 1.0 - poly * jnp.exp(-z * z)
    return jnp.where(x >= 0.0, y, -y)


def _gelu_exact(x):
    # torch.nn.GELU() default (approximate='none'): 0.5*x*(1 + erf(x/sqrt(2)))
    return 0.5 * x * (1.0 + _erf(x * 0.7071067811865476))


def _accum_lane_chunks(x_ref, acc_ref, valid, s_tile):
    """acc += x, one 128-lane chunk at a time (pure vld + vadd, VPU only).

    `valid` (static Python int) = number of valid lanes in this spatial block.
    Lanes past `valid` hold unspecified pad data from a partial edge block:
    fully-padded chunks are skipped, the partial chunk gets a static lane mask.
    """
    a = acc_ref[...]
    for j in range(s_tile // 128):
        lo = j * 128
        if lo >= valid:
            break
        chunk = x_ref[:, :, lo:lo + 128].astype(jnp.float32)
        if valid - lo < 128:
            lane = jax.lax.broadcasted_iota(jnp.int32, (1, 1, 128), 2)
            chunk = jnp.where(lane < (valid - lo), chunk, 0.0)
        a = a + chunk
    acc_ref[...] = a


def _se_kernel(x1_ref, x2_ref, x3_ref, w1_ref, w2_ref, out_ref,
               acc1, acc2, acc3, *, C, s_tile, n_k, rem, inv_s):
    # x*_ref: (b_tile, C, s_tile) native dtype; w1_ref: (3C, R); w2_ref: (R, 3)
    # out_ref: (b_tile, 3) f32; acc*: (b_tile, C, 128) f32 VMEM scratch.
    k = pl.program_id(1)

    @pl.when(k == 0)
    def _init():
        acc1[...] = jnp.zeros_like(acc1)
        acc2[...] = jnp.zeros_like(acc2)
        acc3[...] = jnp.zeros_like(acc3)

    def accumulate(valid):
        _accum_lane_chunks(x1_ref, acc1, valid, s_tile)
        _accum_lane_chunks(x2_ref, acc2, valid, s_tile)
        _accum_lane_chunks(x3_ref, acc3, valid, s_tile)

    if n_k > 1:
        @pl.when(k < n_k - 1)
        def _body():                       # hot loop: unmasked lane-wide adds only
            accumulate(s_tile)

    @pl.when(k == n_k - 1)
    def _tail_and_excite():
        accumulate(rem)                    # (possibly) masked tail block
        # squeeze: single cross-lane reduce + mean scale, once per b-tile
        f1 = jnp.sum(acc1[...], axis=-1) * inv_s       # (b_tile, C) f32
        f2 = jnp.sum(acc2[...], axis=-1) * inv_s
        f3 = jnp.sum(acc3[...], axis=-1) * inv_s
        # excitation: concat([f1,f2,f3]) @ W1 == f1@W1[:C] + f2@W1[C:2C] + f3@W1[2C:]
        w1 = w1_ref[...].astype(jnp.float32)
        h = (jnp.dot(f1, w1[0:C], preferred_element_type=jnp.float32)
             + jnp.dot(f2, w1[C:2 * C], preferred_element_type=jnp.float32)
             + jnp.dot(f3, w1[2 * C:3 * C], preferred_element_type=jnp.float32))
        h = _gelu_exact(h)
        logits = jnp.dot(h, w2_ref[...].astype(jnp.float32),
                         preferred_element_type=jnp.float32)
        out_ref[...] = jax.nn.sigmoid(logits)


# --------------------------------- wrapper -----------------------------------


def scale_aware_se(x1, x2, x3, w1, w2, *, b_tile=None, s_tile=None):
    """Fused ScaleAwareSE forward.

    x1, x2, x3: (B, C, H, W), any float dtype (consumed in native dtype).
    w1: (3*C, R), w2: (R, 3)  -- torch Linear.weight.T (bias-free).
    Returns (B, 3) float32 sigmoid scale weights."""
    B, C, H, W = x1.shape
    assert x2.shape == x1.shape and x3.shape == x1.shape
    S = H * W
    R = w1.shape[1]
    assert w1.shape == (3 * C, R) and w2.shape == (R, 3)

    itemsize = jnp.dtype(x1.dtype).itemsize
    b_tile, s_tile, vmem_cap = _choose_tiles(B, C, S, itemsize, b_tile, s_tile)
    n_b, n_k = _cdiv(B, b_tile), _cdiv(S, s_tile)
    rem = S - (n_k - 1) * s_tile                   # valid lanes in the last block

    # Free, contiguous reshape NCHW -> (B, C, H*W); no pad, no dtype HBM copy.
    xs = [x.reshape(B, C, S) for x in (x1, x2, x3)]

    x_spec = pl.BlockSpec((b_tile, C, s_tile), lambda i, k: (i, 0, k))
    w1_spec = pl.BlockSpec((3 * C, R), lambda i, k: (0, 0))   # constant idx: DMA'd once
    w2_spec = pl.BlockSpec((R, 3), lambda i, k: (0, 0))
    out_spec = pl.BlockSpec((b_tile, 3), lambda i, k: (i, 0))

    w_bytes = (w1.size * jnp.dtype(w1.dtype).itemsize
               + w2.size * jnp.dtype(w2.dtype).itemsize)
    est = (3 * 2 * b_tile * C * s_tile * itemsize      # pipelined input blocks
           + 3 * b_tile * C * 128 * 4                  # lane-wide accumulators
           + 2 * w_bytes + 2 * b_tile * 3 * 4
           + (2 << 20))                                # slack
    vmem_limit = int(min(vmem_cap, max(24 << 20, est)))

    kernel = functools.partial(_se_kernel, C=C, s_tile=s_tile, n_k=n_k,
                               rem=rem, inv_s=1.0 / float(S))

    return pl.pallas_call(
        kernel,
        out_shape=jax.ShapeDtypeStruct((B, 3), jnp.float32),
        grid=(n_b, n_k),
        in_specs=[x_spec, x_spec, x_spec, w1_spec, w2_spec],
        out_specs=out_spec,
        scratch_shapes=[pltpu.VMEM((b_tile, C, 128), jnp.float32)] * 3,
        compiler_params=pltpu.CompilerParams(
            dimension_semantics=("parallel", "arbitrary"),
            vmem_limit_bytes=vmem_limit),
        cost_estimate=pl.CostEstimate(
            flops=3 * B * C * S + 2 * B * 3 * C * R + 2 * B * R * 3,
            transcendentals=B * R + B * 3,
            bytes_accessed=3 * B * C * S * itemsize + w_bytes + B * 3 * 4),
    )(*xs, w1, w2)


# -------------------------------- reference ----------------------------------


def _reference(x1, x2, x3, w1, w2):
    def gap(x):
        return jnp.mean(x.astype(jnp.float32), axis=(2, 3))
    combined = jnp.concatenate([gap(x1), gap(x2), gap(x3)], axis=1)
    h = jax.nn.gelu(combined @ w1.astype(jnp.float32), approximate=False)
    return jax.nn.sigmoid(h @ w2.astype(jnp.float32))


if __name__ == "__main__":
    base_key = jax.random.PRNGKey(0)

    def run_case(case_id, B, C, H, W, **tiles):
        R = max(1, C // 4)                     # reduction_ratio = 4
        ks = jax.random.split(jax.random.fold_in(base_key, case_id), 5)
        x1 = jax.random.normal(ks[0], (B, C, H, W), jnp.float32)
        x2 = jax.random.normal(ks[1], (B, C, H, W), jnp.float32)
        x3 = jax.random.normal(ks[2], (B, C, H, W), jnp.float32)
        w1 = jax.random.normal(ks[3], (3 * C, R), jnp.float32) * 0.2
        w2 = jax.random.normal(ks[4], (R, 3), jnp.float32) * 0.2
        out = jax.block_until_ready(scale_aware_se(x1, x2, x3, w1, w2, **tiles))
        ref = jax.block_until_ready(_reference(x1, x2, x3, w1, w2))
        assert out.shape == (B, 3)
        err = float(jnp.max(jnp.abs(out - ref)))
        assert err < 1e-4, f"case {case_id}: mismatch vs reference ({err})"

    # 1) aligned spatial dim, single-block grid (default tiling).
    run_case(1, B=2, C=8, H=16, W=16)
    # 2) non-128-multiple spatial dim (14x14=196): exercises the multi-step
    #    accumulation path AND the in-kernel tail lane mask.
    run_case(2, B=4, C=8, H=14, W=14, s_tile=128)
    # 3) multi-tile "parallel" B axis (grid(0)=2) + masked spatial tail.
    run_case(3, B=16, C=8, H=14, W=14, b_tile=8, s_tile=128)

    print("KERNEL_OK")
</pallas_src>

<mosaic_0001>
module attributes {stable_mosaic.version = 11 : i64} {
  func.func @_se_kernel(%arg0: i32, %arg1: i32, %arg2: memref<2x8x256xf32, #tpu.memory_space<vmem>>, %arg3: memref<2x8x256xf32, #tpu.memory_space<vmem>>, %arg4: memref<2x8x256xf32, #tpu.memory_space<vmem>>, %arg5: memref<24x2xf32, #tpu.memory_space<vmem>>, %arg6: memref<2x3xf32, #tpu.memory_space<vmem>>, %arg7: memref<2x3xf32, #tpu.memory_space<vmem>>, %arg8: memref<2x8x128xf32, #tpu.memory_space<vmem>>, %arg9: memref<2x8x128xf32, #tpu.memory_space<vmem>>, %arg10: memref<2x8x128xf32, #tpu.memory_space<vmem>>) attributes {dimension_semantics = [#tpu.dimension_semantics<parallel>, #tpu.dimension_semantics<arbitrary>], iteration_bounds = array<i64: 1, 1>, scalar_prefetch = 0 : i64, scratch_operands = 3 : i64, tpu.core_type = #tpu.core_type<tc>, window_params = [{transform_indices = @transform_0, window_bounds = array<i64: 2, 8, 256>}, {transform_indices = @transform_1, window_bounds = array<i64: 2, 8, 256>}, {transform_indices = @transform_2, window_bounds = array<i64: 2, 8, 256>}, {pipeline_mode = #tpu.pipeline_mode<synchronous>, transform_indices = @transform_3, window_bounds = array<i64: 24, 2>}, {pipeline_mode = #tpu.pipeline_mode<synchronous>, transform_indices = @transform_4, window_bounds = array<i64: 2, 3>}, {transform_indices = @transform_5, window_bounds = array<i64: 2, 3>}]} {
    %c0_i32 = arith.constant 0 : i32
    %0 = arith.cmpi eq, %arg1, %c0_i32 : i32
    %1 = arith.extui %0 : i1 to i32
    %c0_i32_0 = arith.constant 0 : i32
    %2 = arith.cmpi ne, %1, %c0_i32_0 : i32
    scf.if %2 {
      %cst = arith.constant 0.000000e+00 : f32
      %6 = vector.broadcast %cst : f32 to vector<2x8x128xf32>
      %c0 = arith.constant 0 : index
      %c0_3 = arith.constant 0 : index
      %c0_4 = arith.constant 0 : index
      %7 = vector.load %arg8[%c0, %c0_3, %c0_4] : memref<2x8x128xf32, #tpu.memory_space<vmem>>, vector<2x8x128xf32>
      tpu.vector_store %arg8[%c0, %c0_3, %c0_4], %6 {strides = array<i32>} : memref<2x8x128xf32, #tpu.memory_space<vmem>>, vector<2x8x128xf32>,
      %cst_5 = arith.constant 0.000000e+00 : f32
      %8 = vector.broadcast %cst_5 : f32 to vector<2x8x128xf32>
      %c0_6 = arith.constant 0 : index
      %c0_7 = arith.constant 0 : index
      %c0_8 = arith.constant 0 : index
      %9 = vector.load %arg9[%c0_6, %c0_7, %c0_8] : memref<2x8x128xf32, #tpu.memory_space<vmem>>, vector<2x8x128xf32>
      tpu.vector_store %arg9[%c0_6, %c0_7, %c0_8], %8 {strides = array<i32>} : memref<2x8x128xf32, #tpu.memory_space<vmem>>, vector<2x8x128xf32>,
      %cst_9 = arith.constant 0.000000e+00 : f32
      %10 = vector.broadcast %cst_9 : f32 to vector<2x8x128xf32>
      %c0_10 = arith.constant 0 : index
      %c0_11 = arith.constant 0 : index
      %c0_12 = arith.constant 0 : index
      %11 = vector.load %arg10[%c0_10, %c0_11, %c0_12] : memref<2x8x128xf32, #tpu.memory_space<vmem>>, vector<2x8x128xf32>
      tpu.vector_store %arg10[%c0_10, %c0_11, %c0_12], %10 {strides = array<i32>} : memref<2x8x128xf32, #tpu.memory_space<vmem>>, vector<2x8x128xf32>,
    } else {
    }
    %c0_i32_1 = arith.constant 0 : i32
    %3 = arith.cmpi eq, %arg1, %c0_i32_1 : i32
    %4 = arith.extui %3 : i1 to i32
    %c0_i32_2 = arith.constant 0 : i32
    %5 = arith.cmpi ne, %4, %c0_i32_2 : i32
    scf.if %5 {
      %c0 = arith.constant 0 : index
      %c0_3 = arith.constant 0 : index
      %c0_4 = arith.constant 0 : index
      %6 = vector.load %arg8[%c0, %c0_3, %c0_4] : memref<2x8x128xf32, #tpu.memory_space<vmem>>, vector<2x8x128xf32>
      %c0_5 = arith.constant 0 : index
      %c0_6 = arith.constant 0 : index
      %c0_7 = arith.constant 0 : index
      %7 = vector.load %arg2[%c0_5, %c0_6, %c0_7] : memref<2x8x256xf32, #tpu.memory_space<vmem>>, vector<2x8x128xf32>
      %8 = arith.addf %6, %7 : vector<2x8x128xf32>
      %c0_8 = arith.constant 0 : index
      %c0_9 = arith.constant 0 : index
      %c128 = arith.constant 128 : index
      %9 = vector.load %arg2[%c0_8, %c0_9, %c128] : memref<2x8x256xf32, #tpu.memory_space<vmem>>, vector<2x8x128xf32>
      %10 = arith.addf %8, %9 : vector<2x8x128xf32>
      %c0_10 = arith.constant 0 : index
      %c0_11 = arith.constant 0 : index
      %c0_12 = arith.constant 0 : index
      %11 = vector.load %arg8[%c0_10, %c0_11, %c0_12] : memref<2x8x128xf32, #tpu.memory_space<vmem>>, vector<2x8x128xf32>
      tpu.vector_store %arg8[%c0_10, %c0_11, %c0_12], %10 {strides = array<i32>} : memref<2x8x128xf32, #tpu.memory_space<vmem>>, vector<2x8x128xf32>,
      %c0_13 = arith.constant 0 : index
      %c0_14 = arith.constant 0 : index
      %c0_15 = arith.constant 0 : index
      %12 = vector.load %arg9[%c0_13, %c0_14, %c0_15] : memref<2x8x128xf32, #tpu.memory_space<vmem>>, vector<2x8x128xf32>
      %c0_16 = arith.constant 0 : index
      %c0_17 = arith.constant 0 : index
      %c0_18 = arith.constant 0 : index
      %13 = vector.load %arg3[%c0_16, %c0_17, %c0_18] : memref<2x8x256xf32, #tpu.memory_space<vmem>>, vector<2x8x128xf32>
      %14 = arith.addf %12, %13 : vector<2x8x128xf32>
      %c0_19 = arith.constant 0 : index
      %c0_20 = arith.constant 0 : index
      %c128_21 = arith.constant 128 : index
      %15 = vector.load %arg3[%c0_19, %c0_20, %c128_21] : memref<2x8x256xf32, #tpu.memory_space<vmem>>, vector<2x8x128xf32>
      %16 = arith.addf %14, %15 : vector<2x8x128xf32>
      %c0_22 = arith.constant 0 : index
      %c0_23 = arith.constant 0 : index
      %c0_24 = arith.constant 0 : index
      %17 = vector.load %arg9[%c0_22, %c0_23, %c0_24] : memref<2x8x128xf32, #tpu.memory_space<vmem>>, vector<2x8x128xf32>
      tpu.vector_store %arg9[%c0_22, %c0_23, %c0_24], %16 {strides = array<i32>} : memref<2x8x128xf32, #tpu.memory_space<vmem>>, vector<2x8x128xf32>,
      %c0_25 = arith.constant 0 : index
      %c0_26 = arith.constant 0 : index
      %c0_27 = arith.constant 0 : index
      %18 = vector.load %arg10[%c0_25, %c0_26, %c0_27] : memref<2x8x128xf32, #tpu.memory_space<vmem>>, vector<2x8x128xf32>
      %c0_28 = arith.constant 0 : index
      %c0_29 = arith.constant 0 : index
      %c0_30 = arith.constant 0 : index
      %19 = vector.load %arg4[%c0_28, %c0_29, %c0_30] : memref<2x8x256xf32, #tpu.memory_space<vmem>>, vector<2x8x128xf32>
      %20 = arith.addf %18, %19 : vector<2x8x128xf32>
      %c0_31 = arith.constant 0 : index
      %c0_32 = arith.constant 0 : index
      %c128_33 = arith.constant 128 : index
      %21 = vector.load %arg4[%c0_31, %c0_32, %c128_33] : memref<2x8x256xf32, #tpu.memory_space<vmem>>, vector<2x8x128xf32>
      %22 = arith.addf %20, %21 : vector<2x8x128xf32>
      %c0_34 = arith.constant 0 : index
      %c0_35 = arith.constant 0 : index
      %c0_36 = arith.constant 0 : index
      %23 = vector.load %arg10[%c0_34, %c0_35, %c0_36] : memref<2x8x128xf32, #tpu.memory_space<vmem>>, vector<2x8x128xf32>
      tpu.vector_store %arg10[%c0_34, %c0_35, %c0_36], %22 {strides = array<i32>} : memref<2x8x128xf32, #tpu.memory_space<vmem>>, vector<2x8x128xf32>,
      %c0_37 = arith.constant 0 : index
      %c0_38 = arith.constant 0 : index
      %c0_39 = arith.constant 0 : index
      %24 = vector.load %arg8[%c0_37, %c0_38, %c0_39] : memref<2x8x128xf32, #tpu.memory_space<vmem>>, vector<2x8x128xf32>
      %cst = arith.constant dense<0.000000e+00> : vector<2x8xf32>
      %25 = vector.multi_reduction <add>, %24, %cst [2] : vector<2x8x128xf32> to vector<2x8xf32>
      %cst_40 = arith.constant 3.906250e-03 : f32
      %26 = vector.broadcast %cst_40 : f32 to vector<2x8xf32>
      %27 = arith.mulf %25, %26 : vector<2x8xf32>
      %c0_41 = arith.constant 0 : index
      %c0_42 = arith.constant 0 : index
      %c0_43 = arith.constant 0 : index
      %28 = vector.load %arg9[%c0_41, %c0_42, %c0_43] : memref<2x8x128xf32, #tpu.memory_space<vmem>>, vector<2x8x128xf32>
      %cst_44 = arith.constant dense<0.000000e+00> : vector<2x8xf32>
      %29 = vector.multi_reduction <add>, %28, %cst_44 [2] : vector<2x8x128xf32> to vector<2x8xf32>
      %cst_45 = arith.constant 3.906250e-03 : f32
      %30 = vector.broadcast %cst_45 : f32 to vector<2x8xf32>
      %31 = arith.mulf %29, %30 : vector<2x8xf32>
      %c0_46 = arith.constant 0 : index
      %c0_47 = arith.constant 0 : index
      %c0_48 = arith.constant 0 : index
      %32 = vector.load %arg10[%c0_46, %c0_47, %c0_48] : memref<2x8x128xf32, #tpu.memory_space<vmem>>, vector<2x8x128xf32>
      %cst_49 = arith.constant dense<0.000000e+00> : vector<2x8xf32>
      %33 = vector.multi_reduction <add>, %32, %cst_49 [2] : vector<2x8x128xf32> to vector<2x8xf32>
      %cst_50 = arith.constant 3.906250e-03 : f32
      %34 = vector.broadcast %cst_50 : f32 to vector<2x8xf32>
      %35 = arith.mulf %33, %34 : vector<2x8xf32>
      %c0_51 = arith.constant 0 : index
      %c0_52 = arith.constant 0 : index
      %36 = vector.load %arg5[%c0_51, %c0_52] : memref<24x2xf32, #tpu.memory_space<vmem>>, vector<24x2xf32>
      %37 = vector.extract_strided_slice %36 {offsets = [0, 0], sizes = [8, 2], strides = [1, 1]} : vector<24x2xf32> to vector<8x2xf32>
      %cst_53 = arith.constant dense<0.000000e+00> : vector<2x2xf32>
      %38 = tpu.matmul %27, %37, %cst_53 {dimension_numbers = #tpu.dot_dimension_numbers<[1], [0], [0], [1], [0, 0, 1, 1], [], []>} : vector<2x8xf32>, vector<8x2xf32>, vector<2x2xf32> -> vector<2x2xf32>
      %39 = vector.extract_strided_slice %36 {offsets = [8, 0], sizes = [8, 2], strides = [1, 1]} : vector<24x2xf32> to vector<8x2xf32>
      %cst_54 = arith.constant dense<0.000000e+00> : vector<2x2xf32>
      %40 = tpu.matmul %31, %39, %cst_54 {dimension_numbers = #tpu.dot_dimension_numbers<[1], [0], [0], [1], [0, 0, 1, 1], [], []>} : vector<2x8xf32>, vector<8x2xf32>, vector<2x2xf32> -> vector<2x2xf32>
      %41 = arith.addf %38, %40 : vector<2x2xf32>
      %42 = vector.extract_strided_slice %36 {offsets = [16, 0], sizes = [8, 2], strides = [1, 1]} : vector<24x2xf32> to vector<8x2xf32>
      %cst_55 = arith.constant dense<0.000000e+00> : vector<2x2xf32>
      %43 = tpu.matmul %35, %42, %cst_55 {dimension_numbers = #tpu.dot_dimension_numbers<[1], [0], [0], [1], [0, 0, 1, 1], [], []>} : vector<2x8xf32>, vector<8x2xf32>, vector<2x2xf32> -> vector<2x2xf32>
      %44 = arith.addf %41, %43 : vector<2x2xf32>
      %cst_56 = arith.constant 5.000000e-01 : f32
      %45 = vector.broadcast %cst_56 : f32 to vector<2x2xf32>
      %46 = arith.mulf %45, %44 : vector<2x2xf32>
      %cst_57 = arith.constant 0.707106769 : f32
      %47 = vector.broadcast %cst_57 : f32 to vector<2x2xf32>
      %48 = arith.mulf %44, %47 : vector<2x2xf32>
      %49 = math.absf %48 : vector<2x2xf32>
      %cst_58 = arith.constant 0.327591091 : f32
      %50 = vector.broadcast %cst_58 : f32 to vector<2x2xf32>
      %51 = arith.mulf %50, %49 : vector<2x2xf32>
      %cst_59 = arith.constant 1.000000e+00 : f32
      %52 = vector.broadcast %cst_59 : f32 to vector<2x2xf32>
      %53 = arith.addf %52, %51 : vector<2x2xf32>
      %cst_60 = arith.constant 1.000000e+00 : f32
      %54 = vector.broadcast %cst_60 : f32 to vector<2x2xf32>
      %55 = arith.divf %54, %53 : vector<2x2xf32>
      %cst_61 = arith.constant 1.06140542 : f32
      %56 = vector.broadcast %cst_61 : f32 to vector<2x2xf32>
      %57 = arith.mulf %56, %55 : vector<2x2xf32>
      %cst_62 = arith.constant -1.45315206 : f32
      %58 = vector.broadcast %cst_62 : f32 to vector<2x2xf32>
      %59 = arith.addf %57, %58 : vector<2x2xf32>
      %60 = arith.mulf %59, %55 : vector<2x2xf32>
      %cst_63 = arith.constant 1.42141378 : f32
      %61 = vector.broadcast %cst_63 : f32 to vector<2x2xf32>
      %62 = arith.addf %60, %61 : vector<2x2xf32>
      %63 = arith.mulf %62, %55 : vector<2x2xf32>
      %cst_64 = arith.constant -0.284496725 : f32
      %64 = vector.broadcast %cst_64 : f32 to vector<2x2xf32>
      %65 = arith.addf %63, %64 : vector<2x2xf32>
      %66 = arith.mulf %65, %55 : vector<2x2xf32>
      %cst_65 = arith.constant 0.254829586 : f32
      %67 = vector.broadcast %cst_65 : f32 to vector<2x2xf32>
      %68 = arith.addf %66, %67 : vector<2x2xf32>
      %69 = arith.mulf %68, %55 : vector<2x2xf32>
      %cst_66 = arith.constant 0.000000e+00 : f32
      %70 = vector.broadcast %cst_66 : f32 to vector<2x2xf32>
      %71 = arith.subf %70, %49 : vector<2x2xf32>
      %72 = arith.mulf %71, %49 : vector<2x2xf32>
      %73 = math.exp %72 : vector<2x2xf32>
      %74 = arith.mulf %69, %73 : vector<2x2xf32>
      %cst_67 = arith.constant 1.000000e+00 : f32
      %75 = vector.broadcast %cst_67 : f32 to vector<2x2xf32>
      %76 = arith.subf %75, %74 : vector<2x2xf32>
      %cst_68 = arith.constant 0.000000e+00 : f32
      %77 = vector.broadcast %cst_68 : f32 to vector<2x2xf32>
      %78 = arith.cmpf oge, %48, %77 : vector<2x2xf32>
      %cst_69 = arith.constant 0.000000e+00 : f32
      %79 = vector.broadcast %cst_69 : f32 to vector<2x2xf32>
      %80 = arith.subf %79, %76 : vector<2x2xf32>
      %81 = arith.select %78, %76, %80 : vector<2x2xi1>, vector<2x2xf32>
      %cst_70 = arith.constant 1.000000e+00 : f32
      %82 = vector.broadcast %cst_70 : f32 to vector<2x2xf32>
      %83 = arith.addf %82, %81 : vector<2x2xf32>
      %84 = arith.mulf %46, %83 : vector<2x2xf32>
      %c0_71 = arith.constant 0 : index
      %c0_72 = arith.constant 0 : index
      %85 = vector.load %arg6[%c0_71, %c0_72] : memref<2x3xf32, #tpu.memory_space<vmem>>, vector<2x3xf32>
      %cst_73 = arith.constant dense<0.000000e+00> : vector<2x3xf32>
      %86 = tpu.matmul %84, %85, %cst_73 {dimension_numbers = #tpu.dot_dimension_numbers<[1], [0], [0], [1], [0, 0, 1, 1], [], []>} : vector<2x2xf32>, vector<2x3xf32>, vector<2x3xf32> -> vector<2x3xf32>
      %87 = arith.negf %86 : vector<2x3xf32>
      %88 = math.exp %87 : vector<2x3xf32>
      %cst_74 = arith.constant 1.000000e+00 : f32
      %89 = vector.broadcast %cst_74 : f32 to vector<2x3xf32>
      %90 = arith.addf %89, %88 : vector<2x3xf32>
      %91 = arith.divf %89, %90 : vector<2x3xf32>
      %c0_75 = arith.constant 0 : index
      %c0_76 = arith.constant 0 : index
      %92 = vector.load %arg7[%c0_75, %c0_76] : memref<2x3xf32, #tpu.memory_space<vmem>>, vector<2x3xf32>
      tpu.vector_store %arg7[%c0_75, %c0_76], %91 {strides = array<i32>} : memref<2x3xf32, #tpu.memory_space<vmem>>, vector<2x3xf32>,
    } else {
    }
    return
  }
  func.func @transform_0(%arg0: i32, %arg1: i32) -> (i32, i32, i32) {
    %c0_i32 = arith.constant 0 : i32
    %c0_i32_0 = arith.constant 0 : i32
    return %arg0, %c0_i32, %arg1 : i32, i32, i32
  }
  func.func @transform_1(%arg0: i32, %arg1: i32) -> (i32, i32, i32) {
    %c0_i32 = arith.constant 0 : i32
    %c0_i32_0 = arith.constant 0 : i32
    return %arg0, %c0_i32, %arg1 : i32, i32, i32
  }
  func.func @transform_2(%arg0: i32, %arg1: i32) -> (i32, i32, i32) {
    %c0_i32 = arith.constant 0 : i32
    %c0_i32_0 = arith.constant 0 : i32
    return %arg0, %c0_i32, %arg1 : i32, i32, i32
  }
  func.func @transform_3(%arg0: i32, %arg1: i32) -> (i32, i32) {
    %c0_i32 = arith.constant 0 : i32
    %c0_i32_0 = arith.constant 0 : i32
    %c0_i32_1 = arith.constant 0 : i32
    return %c0_i32, %c0_i32_0 : i32, i32
  }
  func.func @transform_4(%arg0: i32, %arg1: i32) -> (i32, i32) {
    %c0_i32 = arith.constant 0 : i32
    %c0_i32_0 = arith.constant 0 : i32
    %c0_i32_1 = arith.constant 0 : i32
    return %c0_i32, %c0_i32_0 : i32, i32
  }
  func.func @transform_5(%arg0: i32, %arg1: i32) -> (i32, i32) {
    %c0_i32 = arith.constant 0 : i32
    %c0_i32_0 = arith.constant 0 : i32
    return %arg0, %c0_i32 : i32, i32
  }
}

</mosaic_0001>

<bundles_post_ra>
// kernel: tpu_custom_call.1
= control target key start
LH: loop header
LB: loop body
LE: loop exit
PB: predicated region body
PF: predicated region fallthrough
CT: control target
= control target key end

     0   :  { %10 = vsyncpa [#allocation6], 0  ;;  %s737_s0 = inlined_call_operand.hbm [shape: f32[2,8,256], index: 0, kind: input, shape index: {}]   ;;  %s738_s1 = inlined_call_operand.hbm [shape: f32[2,8,256], index: 1, kind: input, shape index: {}]   ;;  %s739_s2 = inlined_call_operand.vmem [shape: f32[2,8,256], index: 2, kind: input, shape index: {}]   ;;  %s740_s3 = inlined_call_operand.vmem [shape: f32[24,2], index: 3, kind: input, shape index: {}]   ;;  %s741_s4 = inlined_call_operand.vmem [shape: f32[2,3], index: 4, kind: input, shape index: {}]   ;;  %s742_s5 = inlined_call_operand.hbm [shape: f32[2,3], index: 5, kind: output, shape index: {}]  }
   0x1   :  { %11 = vsyncpa [#allocation9], 0 }
   0x2   :  { %12 = vsyncpa [#allocation7], 0  ;;  %s630_s18 = smov [#allocation5]   ;;  %s558_s22 = scalar_lea.hbm %s737_s0, 512 }
   0x3   :  { %s18_s19 = sshll.u32 %s630_s18, 4  ;;  %p559_p0 = scmp.ne.s32.totalorder %s737_s0, %s558_s22  ;;  %s19_s19 = int_to_ptr.vmem [resolvable:$true] %s18_s19 }
   0x4   :  { %p562_p1 = scmp.lt.u32.totalorder %s558_s22, %s737_s0 }
   0x6   :  { %p564_p2 = pnand %p562_p1, %p559_p0 }
   0x8   :  { %567 = shalt.err (!%p564_p2)
}
   0x9   :  { %s568_s27 = scalar_lea.vmem %s19_s19, 512  ;;  %p573_p4 = scmp.lt.s32.totalorder %s19_s19, %s19_s19 }
   0xa   :  { %p569_p3 = scmp.ne.s32.totalorder %s19_s19, %s568_s27  ;;  %p574_p5 = scmp.lt.s32.totalorder %s568_s27, %s568_s27 }
   0xc   :  { %p575_p6 = por %p574_p5, %p573_p4 }
   0xe   :  { %p576_p7 = pnand %p575_p6, %p569_p3 }
  0x10   :  { %579 = shalt.err (!%p576_p7)
}
  0x11   :  { %s631_s28 = smov 256   ;;  %s632_s29 = smov 16  }
  0x12   :  { %24 = dma.hbm_to_vmem [thread:$0]  %s737_s0, 512, %s19_s19, [#allocation6], %s631_s28, %s631_s28, %s632_s29  }
  0x13   :  { %s633_s7 = smov [#allocation8]   ;;  %s580_s11 = scalar_lea.hbm %s738_s1, 512 }
  0x14   :  { %s30_s8 = sshll.u32 %s633_s7, 4  ;;  %p581_p8 = scmp.ne.s32.totalorder %s738_s1, %s580_s11  ;;  %s31_s8 = int_to_ptr.vmem [resolvable:$true] %s30_s8 }
  0x15   :  { %p584_p9 = scmp.lt.u32.totalorder %s580_s11, %s738_s1 }
  0x17   :  { %p586_p10 = pnand %p584_p9, %p581_p8 }
  0x19   :  { %589 = shalt.err (!%p586_p10)
}
  0x1a   :  { %s590_s16 = scalar_lea.vmem %s31_s8, 512  ;;  %p595_p12 = scmp.lt.s32.totalorder %s31_s8, %s31_s8 }
  0x1b   :  { %p591_p11 = scmp.ne.s32.totalorder %s31_s8, %s590_s16  ;;  %p596_p13 = scmp.lt.s32.totalorder %s590_s16, %s590_s16 }
  0x1d   :  { %p597_p0 = por %p596_p13, %p595_p12 }
  0x1f   :  { %p598_p1 = pnand %p597_p0, %p591_p11 }
  0x21   :  { %601 = shalt.err (!%p598_p1)
}
  0x22   :  { %36 = dma.hbm_to_vmem [thread:$0]  %s738_s1, 512, %s31_s8, [#allocation9], %s631_s28, %s631_s28, %s632_s29  }
  0x23   :  { %624 = dma.done.wait [#allocation6], 512  }
  0x24   :  { %625 = vsyncadd [#allocation6], 4294966784 }
  0x25   :  { %626 = dma.done.wait [#allocation9], 512  }
  0x26   :  { %627 = vsyncadd [#allocation9], 4294966784  ;;  %v73_v0 = vld [vmem:[#allocation8] sm:$0xff]  ;;  %v77_v1 = vld [vmem:[#allocation8 + $0x8] sm:$0xff]  ;;  %v634_v20 = vmov 0.0   ;;  %vm635_vm0 = vmmov 0   ;;  %v124_v21 = vlaneseq }
  0x27   :  { %v61_v2 = vld [vmem:[#allocation5] sm:$0xff]  ;;  %v79_v3 = vadd.f32 %v77_v1, %v73_v0  ;;  %v65_v4 = vld [vmem:[#allocation5 + $0x8] sm:$0xff]  ;;  %v74_v5 = vld [vmem:[#allocation8 + $0x10] sm:$0xff]  ;;  %525 = vmatprep.subr.mxu0 %v634_v20  ;;  %520 = vmatprep.subr.mxu1 %v634_v20  ;;  %vm134_vm1 = vcmask 1041409   ;;  %vm136_vm2 = vcmask 64512   ;;  %vm408_vm3 = vcmask 1041408  }
  0x28   :  { %v78_v6 = vld [vmem:[#allocation8 + $0x18] sm:$0xff]  ;;  %v67_v7 = vadd.f32 %v65_v4, %v61_v2  ;;  %v62_v8 = vld [vmem:[#allocation5 + $0x10] sm:$0xff]  ;;  %v85_v14 = vld [vmem:[%s739_s2] sm:$0xff]  ;;  %522 = vmatprep.mubr.msk.f32.mxu1 %vm635_vm0, %v634_v20  ;;  %527 = vmatprep.mubr.msk.f32.mxu0 %vm635_vm0, %v634_v20  ;;  %v125_v22 = vand.u32 127, %v124_v21  ;;  %v127_v23 = vshrl.u32 %v124_v21, 7  ;;  %vm404_vm5 = vcmask 15360  }
  0x29   :  { %v66_v9 = vld [vmem:[#allocation5 + $0x18] sm:$0xff]  ;;  %105 = vadd.xlane.f32.xlu1 %v79_v3  ;;  %v80_v10 = vadd.f32 %v78_v6, %v74_v5  ;;  %v86_v12 = vld [vmem:[%s739_s2 + $0x10] sm:$0xff]  ;;  %v89_v15 = vld [vmem:[%s739_s2 + $0x8] sm:$0xff]  ;;  %vm488_vm6 = vcmask 17408  }
  0x2a   :  { %97 = vadd.xlane.f32.xlu0 %v67_v7  ;;  %v68_v11 = vadd.f32 %v66_v9, %v62_v8  ;;  %v90_v13 = vld [vmem:[%s739_s2 + $0x18] sm:$0xff]  ;;  %v91_v17 = vadd.f32 %v89_v15, %v85_v14  ;;  %v119_v18 = vld [vmem:[%s740_s3] sm:$0xff]  ;;  %v120_v19 = vld [vmem:[%s740_s3 + $0x8] sm:$0xff]  ;;  %v128_v27 = vsub.s32 %v125_v22, %v127_v23 }
  0x2b   :  { %v92_v16 = vadd.f32 %v90_v13, %v86_v12  ;;  %526 = vmatpush3.msra.mxu0 %v119_v18  ;;  %521 = vmatpush3.msra.mxu1 %v120_v19  ;;  %v121_v39 = vld [vmem:[%s740_s3 + $0x10] sm:$0xff]  ;;  %v403_v47 = vld [vmem:[%s741_s4] sm:$0x3]  ;;  %s636_s4 = smov [#allocation10]  }
  0x2c   :  { %530 = vmatprep.subr.mxu0 %v634_v20  ;;  %535 = vmatprep.subr.mxu1 %v634_v20  ;;  %s496_s6 = sshll.u32 %s636_s4, 4  ;;  %s497_s6 = int_to_ptr.vmem [resolvable:$true] %s496_s6 }
  0x2d   :  { %107 = vadd.xlane.f32.xlu1 %v80_v10  ;;  %s602_s7 = scalar_lea.vmem %s497_s6, 32  ;;  %p607_p3 = scmp.lt.s32.totalorder %s497_s6, %s497_s6 }
  0x2e   :  { %99 = vadd.xlane.f32.xlu0 %v68_v11  ;;  %p603_p2 = scmp.ne.s32.totalorder %s497_s6, %s602_s7  ;;  %p608_p4 = scmp.lt.s32.totalorder %s602_s7, %s602_s7 }
  0x30   :  { %p609_p5 = por %p608_p4, %p607_p3 }
  0x31   :  { %115 = vadd.xlane.f32.xlu1 %v92_v16 }
  0x32   :  { %113 = vadd.xlane.f32.xlu0 %v91_v17  ;;  %p610_p6 = pnand %p609_p5, %p603_p2 }
  0xb6   :  { %v106_v24 = vpop.xlane.xlu1 %105 }
  0xb7   :  { %v109_v25 = vmul.f32 0.00390625, %v106_v24  ;;  %v98_v26 = vpop.xlane.xlu0 %97 }
  0xb8   :  { %v101_v28 = vmul.f32 0.00390625, %v98_v26 }
  0xb9   :  { %v129_v30 = vrot.slane %v109_v25, %v128_v27 }
  0xba   :  { %v108_v29 = vpop.xlane.xlu1 %107  ;;  %v214_v35 = vrot.slane %v101_v28, %v128_v27 }
  0xbb   :  { %v110_v31 = vmul.f32 0.00390625, %v108_v29  ;;  %v100_v32 = vpop.xlane.xlu0 %99 }
  0xbc   :  { %v102_v33 = vmul.f32 0.00390625, %v100_v32 }
  0xbd   :  { %v133_v34 = vrot.slane %v110_v31, %v128_v27 }
  0xbe   :  { %v218_v36 = vrot.slane %v102_v33, %v128_v27  ;;  %v116_v37 = vpop.xlane.xlu1 %115 }
  0xbf   :  { %v135_v38 = vsel %vm134_vm1, %v133_v34, %v129_v30  ;;  %v118_v40 = vmul.f32 0.00390625, %v116_v37  ;;  %v114_v41 = vpop.xlane.xlu0 %113 }
  0xc0   :  { %523 = vmatmul.mubr.msk.f32.vlgmr.msra.gmra.mrb[0].mxu1 %vm136_vm2, %v135_v38  ;;  %v219_v42 = vsel %vm134_vm1, %v218_v36, %v214_v35  ;;  %v117_v43 = vmul.f32 0.00390625, %v114_v41 }
  0xc1   :  { %528 = vmatmul.mubr.msk.f32.vlgmr.msra.gmra.mrb[0].mxu0 %vm136_vm2, %v219_v42  ;;  %537 = vmatprep.mubr.msk.f32.mxu1 %vm635_vm0, %v634_v20  ;;  %v301_v44 = vrot.slane %v118_v40, %v128_v27 }
  0xc2   :  { %531 = vmatpush3.msra.mxu0 %v121_v39  ;;  %v297_v45 = vrot.slane %v117_v43, %v128_v27  ;;  %532 = vmatprep.mubr.msk.f32.mxu0 %vm635_vm0, %v634_v20 }
  0xc3   :  { %536 = vmatpush3.msk.msra.mxu1 %vm408_vm3, %v403_v47 }
  0xc4   :  { %v302_v46 = vsel %vm134_vm1, %v301_v44, %v297_v45 }
  0xc9   :  { %533 = vmatmul.mubr.msk.f32.vlgmr.msra.gmra.mrb[0].mxu0 %vm136_vm2, %v302_v46 }
 0x193   :  { %v205_v48 = vpop.f32.mrb[0].mxu1 }
 0x194   :  { %v524_v49 = vpop.f32.mrb[1].mxu1 }
 0x19c   :  { %v371_v50 = vpop.f32.mrb[0].mxu0 }
 0x19d   :  { %v540_v51 = vadd.f32 %v371_v50, %v205_v48  ;;  %v534_v52 = vpop.f32.mrb[1].mxu0 }
 0x19f   :  { %v377_v53 = vmul.f32 0.70710677, %v540_v51  ;;  %v376_v11 = vmul.f32 0.5, %v540_v51 }
 0x1a1   :  { %v378_v54 = vand.u32 2147483647, %v377_v53  ;;  %vm398_vm4 = vcmp.ge.f32.partialorder %v377_v53, 0.0 }
 0x1a3   :  { %v379_v55 = vmul.f32 0.3275911, %v378_v54  ;;  %v392_v57 = vsub.f32 0.0, %v378_v54 }
 0x1a5   :  { %v380_v56 = vadd.f32 1.0, %v379_v55  ;;  %v393_v59 = vmul.f32 %v392_v57, %v378_v54 }
 0x1a7   :  { %550 = vrcp.f32 %v380_v56  ;;  %v394_v62 = vmul.f32 1.442695, %v393_v59 }
 0x1a9   :  { %552 = vpow2.f32 %v394_v62 }
 0x1b1   :  { %v551_v58 = vpop.eup %550 }
 0x1b2   :  { %v383_v60 = vmul.f32 1.0614054, %v551_v58 }
 0x1b3   :  { %v553_v6 = vpop.eup %552 }
 0x1b4   :  { %v384_v61 = vadd.f32 -1.4531521, %v383_v60 }
 0x1b6   :  { %v385_v63 = vmul.f32 %v551_v58, %v384_v61 }
 0x1b8   :  { %v386_v0 = vadd.f32 1.4214138, %v385_v63 }
 0x1ba   :  { %v387_v1 = vmul.f32 %v551_v58, %v386_v0 }
 0x1bc   :  { %v388_v2 = vadd.f32 -0.28449672, %v387_v1 }
 0x1be   :  { %v389_v3 = vmul.f32 %v551_v58, %v388_v2 }
 0x1c0   :  { %v390_v4 = vadd.f32 0.2548296, %v389_v3 }
 0x1c2   :  { %v391_v5 = vmul.f32 %v551_v58, %v390_v4 }
 0x1c4   :  { %v396_v7 = vmul.f32 %v553_v6, %v391_v5 }
 0x1c6   :  { %v397_v8 = vsub.f32 1.0, %v396_v7 }
 0x1c8   :  { %v399_v9 = vsub.f32 0.0, %v397_v8 }
 0x1ca   :  { %v400_v10 = vsel %vm398_vm4, %v397_v8, %v399_v9 }
 0x1cb   :  { %v401_v12 = vadd.f32 1.0, %v400_v10 }
 0x1cd   :  { %v402_v13 = vmul.f32 %v401_v12, %v376_v11 }
 0x1cf   :  { %538 = vmatmul.mubr.msk.f32.vlgmr.msra.gmra.mrb[2].mxu1 %vm404_vm5, %v402_v13 }
 0x2a2   :  { %v478_v14 = vpop.f32.mrb[2].mxu1 }
 0x2a3   :  { %v511_v15 = vmul.f32 -1.442695, %v478_v14  ;;  %v539_v16 = vpop.f32.mrb[3].mxu1 }
 0x2a5   :  { %554 = vpow2.f32 %v511_v15 }
 0x2af   :  { %v555_v17 = vpop.eup %554 }
 0x2b0   :  { %v485_v18 = vadd.f32 1.0, %v555_v17 }
 0x2b2   :  { %556 = vrcp.f32 %v485_v18 }
 0x2bc   :  { %v557_v19 = vpop.eup %556 }
 0x2bd   :  { %489 = vst.msk [vmem:[#allocation10] sm:$0x3] %vm488_vm6, %v557_v19 }
 0x2be   :  { %613 = shalt.err (!%p610_p6)
}
 0x2bf   :  { %s614_s10 = scalar_lea.hbm %s742_s5, 32 }
 0x2c0   :  { %p615_p7 = scmp.ne.s32.totalorder %s742_s5, %s614_s10  ;;  %p618_p8 = scmp.lt.u32.totalorder %s614_s10, %s742_s5 }
 0x2c2   :  { %p620_p9 = pnand %p618_p8, %p615_p7 }
 0x2c4   :  { %623 = shalt.err (!%p620_p9)
}
 0x2c5   :  { %499 = dma.vmem_to_hbm [thread:$0]  %s497_s6, 32, %s742_s5, [#allocation7]  }
 0x2c6   :  { %628 = dma.done.wait [#allocation7], 32  }
 0x2c7   :  { %629 = vsyncadd [#allocation7], 4294967264 }
 0x2c8   :  { %503 = vsyncpa [#allocation6], 1 }
 0x2c9   :  { %504 = vsyncpa [#allocation9], 1 }
 0x2ca   :  { %505 = vsyncpa [#allocation7], 1 }

</bundles_post_ra>
